<compile_context>
chip_gen: v7x
topology: tpu7x:2x2x1
jax: 0.10.0
libtpu: 0.0.40
codegen_flags: <defaults>
</compile_context>

<pallas_src>
import jax
import jax.numpy as jnp
from jax.experimental import pallas as pl
from jax.experimental.pallas import tpu as pltpu


def gin_graph_conv_kernel(a_ref, x_ref, w_ref, b_ref, o_ref):
    # a_ref: (Bt, Np, Np) f32   adjacency block (cast to bf16 in-VMEM)
    # x_ref: (Bt, Np, D)  f32   features block  (cast to bf16 in-VMEM)
    # w_ref: (2D, Fp)     bf16  weight, zero-padded to Fp lanes
    # b_ref: (1, Fp)      f32   bias, zero-padded
    # o_ref: (Bt, Np, Fp) f32   output block (lane-dense, Fp % 128 == 0)
    Bt, Np, D = x_ref.shape
    Fp = o_ref.shape[-1]

    a_bf = a_ref[...].astype(jnp.bfloat16)
    x_bf = x_ref[...].astype(jnp.bfloat16)

    # neighbors = A @ X : contraction over N, output width D (MXU, f32 acc).
    neigh = jnp.einsum(
        "bij,bjd->bid", a_bf, x_bf, preferred_element_type=jnp.float32
    )  # (Bt, Np, D) f32

    # One concat matmul [X | neigh] @ W with K = 2D, M = Bt*Np, N = Fp.
    cat = jnp.concatenate([x_bf, neigh.astype(jnp.bfloat16)], axis=-1)  # (Bt, Np, 2D)
    cat2d = cat.reshape(Bt * Np, 2 * D)
    out = jnp.dot(cat2d, w_ref[...], preferred_element_type=jnp.float32)  # (Bt*Np, Fp)
    out = out.reshape(Bt, Np, Fp) + b_ref[...]

    # Bias + ReLU in f32 (VPU), unmasked lane-dense store.
    o_ref[...] = jnp.maximum(out, 0.0).astype(o_ref.dtype)


def prepare_gin_params(weight, bias):
    """One-time parameter prep (call at init, NOT per forward).

    weight: (2D, F) f32, bias: (F,) f32
    Returns (w_bf16 padded to Fp lanes, bias f32 (1, Fp)).
    """
    two_d, f_out = weight.shape
    fp = ((f_out + 127) // 128) * 128
    pad_f = fp - f_out
    if pad_f:
        weight = jnp.pad(weight, ((0, 0), (0, pad_f)))
        bias = jnp.pad(bias, (0, pad_f))
    return weight.astype(jnp.bfloat16), bias.reshape(1, fp).astype(jnp.float32)


def _vmem_capacity_bytes():
    try:
        return int(pltpu.get_tpu_info().vmem_capacity_bytes)
    except Exception:
        return 64 << 20  # conservative (v7x per-TC)


def gin_graph_conv(features, A, w_bf, b2d, *, out_features=None,
                   batch_tile=None, return_padded=False):
    """GIN graph-conv forward.

    features: (B, N, D) f32, A: (B, N, N) f32,
    w_bf: (2D, Fp) bf16 (from prepare_gin_params), b2d: (1, Fp) f32.
    """
    B, N, D = features.shape
    assert w_bf.shape[0] == 2 * D
    Fp = w_bf.shape[1]
    F_out = Fp if out_features is None else out_features

    # ---- pad N to a multiple of 8 so in-kernel reshapes stay tile-aligned ----
    Np = ((N + 7) // 8) * 8
    if Np != N:
        features = jnp.pad(features, ((0, 0), (0, Np - N), (0, 0)))
        A = jnp.pad(A, ((0, 0), (0, Np - N), (0, Np - N)))

    # ---- VMEM-aware batch-tile heuristic -------------------------------------
    vmem_cap = _vmem_capacity_bytes()
    vmem_budget = vmem_cap // 2  # leave headroom for compiler scratch

    def vmem_needed(bt):
        a_blk = bt * Np * Np * 4           # f32 adjacency block
        x_blk = bt * Np * D * 4            # f32 feature block
        o_blk = bt * Np * Fp * 4           # f32 output block
        w_blk = 2 * D * Fp * 2 + Fp * 4    # bf16 weight + f32 bias (single-buffered)
        return 2 * (a_blk + x_blk + o_blk) + w_blk  # in/out double-buffered

    if batch_tile is None:
        Bt = max(1, min(B, -(-256 // Np)))      # target weight-matmul M >= 256
        if B > 1:
            Bt = min(Bt, -(-B // 2))            # keep grid >= 2 (v7x dual-TC / megacore)
        while Bt > 1 and vmem_needed(Bt) > vmem_budget:
            Bt -= 1
    else:
        Bt = batch_tile

    Bp = ((B + Bt - 1) // Bt) * Bt
    if Bp != B:
        features = jnp.pad(features, ((0, Bp - B), (0, 0), (0, 0)))
        A = jnp.pad(A, ((0, Bp - B), (0, 0), (0, 0)))

    flops = 2 * Bp * Np * Np * D + 2 * Bp * Np * (2 * D) * Fp
    bytes_accessed = (Bp * Np * Np * 4 + Bp * Np * D * 4
                      + 2 * D * Fp * 2 + Fp * 4 + Bp * Np * Fp * 4)
    vmem_limit = int(min(0.9 * vmem_cap, max(2 * vmem_needed(Bt), 32 << 20)))

    out = pl.pallas_call(
        gin_graph_conv_kernel,
        out_shape=jax.ShapeDtypeStruct((Bp, Np, Fp), features.dtype),
        grid_spec=pltpu.PrefetchScalarGridSpec(
            num_scalar_prefetch=0,
            grid=(Bp // Bt,),
            in_specs=[
                pl.BlockSpec((Bt, Np, Np), lambda b: (b, 0, 0)),   # A block (f32)
                pl.BlockSpec((Bt, Np, D), lambda b: (b, 0, 0)),    # X block (f32)
                pl.BlockSpec((2 * D, Fp), lambda b: (0, 0)),       # weight (bf16)
                pl.BlockSpec((1, Fp), lambda b: (0, 0)),           # bias (f32)
            ],
            out_specs=pl.BlockSpec((Bt, Np, Fp), lambda b: (b, 0, 0)),
        ),
        compiler_params=pltpu.CompilerParams(
            dimension_semantics=("parallel",),
            vmem_limit_bytes=vmem_limit,
        ),
        cost_estimate=pl.CostEstimate(
            flops=flops, transcendentals=0, bytes_accessed=bytes_accessed),
    )(A, features, w_bf, b2d)

    if return_padded:
        # Padded batch rows hold relu(bias), padded N rows/F lanes are junk/zero;
        # only use this path if the consumer understands the padded layout.
        return out
    return out[:B, :N, :F_out]


def _xavier_uniform(key, shape, dtype=jnp.float32):
    fan_in, fan_out = shape
    limit = (6.0 / (fan_in + fan_out)) ** 0.5
    return jax.random.uniform(key, shape, dtype, minval=-limit, maxval=limit)


if __name__ == "__main__":
    key = jax.random.PRNGKey(0)
    k_x, k_a, k_w = jax.random.split(key, 3)

    # Small shapes consistent with the module's forward: b=2, n=16, in_dim=32, out_dim=32
    B, N, D, F_out = 2, 16, 32, 32

    features = jax.random.normal(k_x, (B, N, D), dtype=jnp.float32)
    A = jax.random.uniform(k_a, (B, N, N), dtype=jnp.float32)

    # Parameters: weight (2*in_dim, out_dim) xavier_uniform, bias zeros.
    weight = _xavier_uniform(k_w, (2 * D, F_out))
    bias = jnp.zeros((F_out,), dtype=jnp.float32)

    # One-time parameter prep (outside the per-call hot path).
    w_bf, b2d = prepare_gin_params(weight, bias)

    out = gin_graph_conv(features, A, w_bf, b2d, out_features=F_out)
    out = jax.block_until_ready(out)

    # Pure-JAX f32 reference of the exact PyTorch semantics.
    neigh = jnp.einsum("bij,bjd->bid", A, features)
    combined = jnp.concatenate([features, neigh], axis=2)
    ref = jnp.maximum(jnp.einsum("bnd,df->bnf", combined, weight) + bias, 0.0)

    assert out.shape == (B, N, F_out)
    # bf16 MXU inputs with f32 accumulation -> loosened tolerance vs f32 reference.
    assert jnp.allclose(out, ref, atol=5e-2, rtol=5e-2), (
        float(jnp.max(jnp.abs(out - ref))))

    print("KERNEL_OK")
</pallas_src>

<mosaic_0001>
module attributes {stable_mosaic.version = 11 : i64} {
  func.func @gin_graph_conv_kernel(%arg0: i32, %arg1: memref<1x16x16xf32, #tpu.memory_space<vmem>>, %arg2: memref<1x16x32xf32, #tpu.memory_space<vmem>>, %arg3: memref<64x128xbf16, #tpu.memory_space<vmem>>, %arg4: memref<1x128xf32, #tpu.memory_space<vmem>>, %arg5: memref<1x16x128xf32, #tpu.memory_space<vmem>>) attributes {dimension_semantics = [#tpu.dimension_semantics<parallel>], iteration_bounds = array<i64: 2>, scalar_prefetch = 0 : i64, scratch_operands = 0 : i64, tpu.core_type = #tpu.core_type<tc>, window_params = [{transform_indices = @transform_0, window_bounds = array<i64: 1, 16, 16>}, {transform_indices = @transform_1, window_bounds = array<i64: 1, 16, 32>}, {pipeline_mode = #tpu.pipeline_mode<synchronous>, transform_indices = @transform_2, window_bounds = array<i64: 64, 128>}, {pipeline_mode = #tpu.pipeline_mode<synchronous>, transform_indices = @transform_3, window_bounds = array<i64: 1, 128>}, {transform_indices = @transform_4, window_bounds = array<i64: 1, 16, 128>}]} {
    %c0 = arith.constant 0 : index
    %c0_0 = arith.constant 0 : index
    %c0_1 = arith.constant 0 : index
    %0 = vector.load %arg1[%c0, %c0_0, %c0_1] : memref<1x16x16xf32, #tpu.memory_space<vmem>>, vector<1x16x16xf32>
    %1 = arith.truncf %0 : vector<1x16x16xf32> to vector<1x16x16xbf16>
    %c0_2 = arith.constant 0 : index
    %c0_3 = arith.constant 0 : index
    %c0_4 = arith.constant 0 : index
    %2 = vector.load %arg2[%c0_2, %c0_3, %c0_4] : memref<1x16x32xf32, #tpu.memory_space<vmem>>, vector<1x16x32xf32>
    %3 = arith.truncf %2 : vector<1x16x32xf32> to vector<1x16x32xbf16>
    "tpu.trace_start"() <{level = 10 : i32, message = "bij,bjd->bid"}> : () -> ()
    %cst = arith.constant dense<0.000000e+00> : vector<1x16x32xf32>
    %4 = tpu.matmul %1, %3, %cst {dimension_numbers = #tpu.dot_dimension_numbers<[2], [1], [1], [2], [0, 0, 0, 1, 1, 2], [0], [0]>} : vector<1x16x16xbf16>, vector<1x16x32xbf16>, vector<1x16x32xf32> -> vector<1x16x32xf32>
    "tpu.trace_stop"() : () -> ()
    %5 = arith.truncf %4 : vector<1x16x32xf32> to vector<1x16x32xbf16>
    %6 = tpu.concatenate %3, %5 in 2 : vector<1x16x32xbf16>, vector<1x16x32xbf16> -> vector<1x16x64xbf16>
    %7 = vector.shape_cast %6 : vector<1x16x64xbf16> to vector<16x64xbf16>
    %c0_5 = arith.constant 0 : index
    %c0_6 = arith.constant 0 : index
    %8 = vector.load %arg3[%c0_5, %c0_6] : memref<64x128xbf16, #tpu.memory_space<vmem>>, vector<64x128xbf16>
    %cst_7 = arith.constant dense<0.000000e+00> : vector<16x128xf32>
    %9 = tpu.matmul %7, %8, %cst_7 {dimension_numbers = #tpu.dot_dimension_numbers<[1], [0], [0], [1], [0, 0, 1, 1], [], []>} : vector<16x64xbf16>, vector<64x128xbf16>, vector<16x128xf32> -> vector<16x128xf32>
    %10 = vector.shape_cast %9 : vector<16x128xf32> to vector<1x16x128xf32>
    %c0_8 = arith.constant 0 : index
    %c0_9 = arith.constant 0 : index
    %11 = vector.load %arg4[%c0_8, %c0_9] : memref<1x128xf32, #tpu.memory_space<vmem>>, vector<1x128xf32>
    %12 = vector.shape_cast %11 : vector<1x128xf32> to vector<1x1x128xf32>
    %13 = vector.broadcast %12 : vector<1x1x128xf32> to vector<1x16x128xf32>
    %14 = arith.addf %10, %13 : vector<1x16x128xf32>
    %cst_10 = arith.constant 0.000000e+00 : f32
    %15 = vector.broadcast %cst_10 : f32 to vector<1x16x128xf32>
    %16 = arith.maximumf %14, %15 : vector<1x16x128xf32>
    %c0_11 = arith.constant 0 : index
    %c0_12 = arith.constant 0 : index
    %c0_13 = arith.constant 0 : index
    %17 = vector.load %arg5[%c0_11, %c0_12, %c0_13] : memref<1x16x128xf32, #tpu.memory_space<vmem>>, vector<1x16x128xf32>
    tpu.vector_store %arg5[%c0_11, %c0_12, %c0_13], %16 {strides = array<i32>} : memref<1x16x128xf32, #tpu.memory_space<vmem>>, vector<1x16x128xf32>,
    return
  }
  func.func @transform_0(%arg0: i32) -> (i32, i32, i32) {
    %c0_i32 = arith.constant 0 : i32
    %c0_i32_0 = arith.constant 0 : i32
    %c0_i32_1 = arith.constant 0 : i32
    return %arg0, %c0_i32, %c0_i32_0 : i32, i32, i32
  }
  func.func @transform_1(%arg0: i32) -> (i32, i32, i32) {
    %c0_i32 = arith.constant 0 : i32
    %c0_i32_0 = arith.constant 0 : i32
    %c0_i32_1 = arith.constant 0 : i32
    return %arg0, %c0_i32, %c0_i32_0 : i32, i32, i32
  }
  func.func @transform_2(%arg0: i32) -> (i32, i32) {
    %c0_i32 = arith.constant 0 : i32
    %c0_i32_0 = arith.constant 0 : i32
    %c0_i32_1 = arith.constant 0 : i32
    return %c0_i32, %c0_i32_0 : i32, i32
  }
  func.func @transform_3(%arg0: i32) -> (i32, i32) {
    %c0_i32 = arith.constant 0 : i32
    %c0_i32_0 = arith.constant 0 : i32
    %c0_i32_1 = arith.constant 0 : i32
    return %c0_i32, %c0_i32_0 : i32, i32
  }
  func.func @transform_4(%arg0: i32) -> (i32, i32, i32) {
    %c0_i32 = arith.constant 0 : i32
    %c0_i32_0 = arith.constant 0 : i32
    %c0_i32_1 = arith.constant 0 : i32
    return %arg0, %c0_i32, %c0_i32_0 : i32, i32, i32
  }
}

</mosaic_0001>

<bundles_post_ra>
// kernel: tpu_custom_call.1
= control target key start
LH: loop header
LB: loop body
LE: loop exit
PB: predicated region body
PF: predicated region fallthrough
CT: control target
= control target key end

     0   :  { %s1132_s0 = inlined_call_operand.hbm [shape: f32[2,16,16], index: 0, kind: input, shape index: {}]   ;;  %s1133_s1 = inlined_call_operand.hbm [shape: f32[2,16,32], index: 1, kind: input, shape index: {}]   ;;  %s1134_s2 = inlined_call_operand.hbm [shape: bf16[64,128], index: 2, kind: input, shape index: {}]   ;;  %s1135_s3 = inlined_call_operand.vmem [shape: f32[1,128], index: 3, kind: input, shape index: {}]   ;;  %s1136_s4 = inlined_call_operand.hbm [shape: f32[2,16,128], index: 4, kind: output, shape index: {}]  }
   0x1   :  { %1140 = sst [smem:[#allocation13_spill]] %s1132_s0 }
   0x2   :  { %9 = vsyncpa [#allocation3], 0 }
   0x3   :  { %11 = vsyncpa [#allocation3 + $0x1], 0 }
   0x4   :  { %12 = vsyncpa [#allocation6], 0 }
   0x5   :  { %14 = vsyncpa [#allocation6 + $0x1], 0 }
   0x6   :  { %15 = vsyncpa [#allocation4], 0 }
   0x7   :  { %17 = vsyncpa [#allocation4 + $0x1], 0  ;;  %s870_s15 = smov 0   ;;  %s872_s16 = smov 0  }
   0x8   :  { %s874_s17 = smov 0   ;;  %s876_s18 = smov 0  }
   0x9 LB: > { %s891_s19 = sadd.s32 4294967295, %s830_s18   ;;  %s538_s20 = sadd.s32 4294967294, %s830_s18   ;;  %s830_s18 = sphi %s876_s18, %s1158_s18   ;;  %s826_s17 = sphi %s874_s17, %s1157_s17   ;;  %s822_s16 = sphi %s872_s16, %s1156_s16   ;;  %s818_s15 = sphi %s870_s15, %s1155_s15  }
   0xa   : > { %p43_p0 = scmp.ne.s32.totalorder %s822_s16, %s818_s15  ;;  %p1137_p1 = scmp.eq.s32.totalorder %s891_s19, 0 }
   0xb   : > { %p141_p3 = scmp.eq.s32.totalorder %s538_s20, 1  ;;  %p539_p5 = scmp.ge.s32.totalorder %s830_s18, 1 }
   0xc   : > { %p900_p4 = por %p1137_p1, %p43_p0  ;;  %p148_p7 = scmp.lt.s32.totalorder %s830_s18, 3 }
   0xd   : > { %p905_p6 = por %p141_p3, %p43_p0  ;;  %s832_s24 = smov [#allocation7]  }
   0xe   : > { %s1141_s21 = scalar_select %p900_p4, 1, 0 }
   0xf   : > { %s1142_s22 = scalar_select %p905_p6, 1, 0 }
  0x10   : > { %p910_p8 = pnand %p539_p5, %p148_p7  ;;  %s160_s25 = sshll.u32 %s832_s24, 4  ;;  %s914_s25 = int_to_ptr.vmem [resolvable:$true] %s160_s25 }
  0x11   : > { %s926_s27 = sadd.s32 1, %s830_s18   ;;  %s30_s28 = sadd.s32 1, %s826_s17 }
  0x12   : > { %s1143_s23 = scalar_select %p910_p8, 1, 0 }
  0x13   : > { %p603_p9 = pneg %p910_p8  ;;  %s27_s29 = ssub.s32 %s830_s18, %s926_s27 }
  0x14   : > { %s668_s6 = scalar_lea.hbm %s1134_s2, 512 }
  0x15   : > { %p921_p11 = pnand %p603_p9, %p1137_p1  ;;  %p669_p12 = scmp.ne.s32.totalorder %s1134_s2, %s668_s6 }
  0x16   : > { %p675_p5 = scmp.lt.u32.totalorder %s668_s6, %s1134_s2 }
  0x17   : > { %p670_p13 = pneg %p921_p11 }
  0x19   : > { %p671_p0 = pnand %p670_p13, %p669_p12 }
  0x1b   : > { %p672_p3 = pneg %p671_p0 }
  0x1d   : > { %p677_p7 = pnand %p675_p5, %p672_p3 }
  0x1f   : > { %680 = shalt.err (!%p677_p7)
}
  0x20   : > { %s681_s11 = scalar_lea.vmem %s914_s25, 512  ;;  %p689_p2 = scmp.lt.s32.totalorder %s914_s25, %s914_s25 }
  0x21   : > { %p682_p9 = scmp.ne.s32.totalorder %s914_s25, %s681_s11  ;;  %p690_p6 = scmp.lt.s32.totalorder %s681_s11, %s681_s11 }
  0x23   : > { %p684_p10 = pnand %p682_p9, %p670_p13  ;;  %p691_p4 = por %p690_p6, %p689_p2 }
  0x25   : > { %p685_p1 = pneg %p684_p10 }
  0x27   : > { %p692_p8 = pnand %p691_p4, %p685_p1 }
  0x29   : > { %695 = shalt.err (!%p692_p8)
}
  0x2a   : > { %s833_s12 = smov 64   ;;  %s834_s13 = smov 4  }
  0x2b   : > { %606 = dma.hbm_to_vmem [thread:$0]  (!%p921_p11), %s1134_s2, 512, %s914_s25, [#allocation6], %s833_s12, %s833_s12, %s834_s13  }
  0x2c   : > { %p28_p1 = scmp.eq.s32.totalorder %s27_s29, 0  ;;  %p37_p2 = scmp.ne.s32.totalorder %s826_s17, %s822_s16 }
  0x2d   : > { %p38_p4 = scmp.eq.s32.totalorder %s830_s18, 0  ;;  %p619_p6 = scmp.lt.s32.totalorder %s830_s18, 2 }
  0x2e   : > { %s957_s24 = scalar_select %p28_p1, %s826_s17, %s30_s28  }
  0x2f   : > { %p39_p8 = por %p38_p4, %p37_p2  ;;  %p1145_p10 = scmp.eq.s32.totalorder %s891_s19, 1 }
  0x30   : > { %s177_s5 = sand.u32 1, %s826_s17   ;;  %s565_s6 = sshll.u32 %s830_s18, 8 }
  0x31   : > { %p961_p12 = por %p1145_p10, %p37_p2  ;;  %s967_s7 = sshll.u32 %s177_s5, 4 }
  0x32   : > { %s1147_s0 = sld [smem:[#allocation13_spill]]  ;;  %s181_s28 = scalar_lea.vmem [#allocation2], %s967_s7 }
  0x33   : > { %s188_s29 = sshll.u32 %s181_s28, 4  ;;  %p977_p11 = pnand %p619_p6, %p39_p8  ;;  %s981_s29 = int_to_ptr.vmem [resolvable:$true] %s188_s29 }
  0x34   : > { %s983_s10 = scalar_lea.sflag [#allocation3], %s177_s5 }
  0x35   : > { %p698_p0 = pneg %p977_p11 }
  0x38   : > { %s974_s25 = scalar_lea.hbm %s1147_s0, %s565_s6  ;;  %s701_s14 = scalar_lea.hbm %s1147_s0, 512 }
  0x39   : > { %s696_s11 = scalar_lea.hbm %s974_s25, 256  ;;  %p702_p7 = scmp.lt.u32.totalorder %s974_s25, %s1147_s0 }
  0x3a   : > { %p697_p13 = scmp.ne.s32.totalorder %s974_s25, %s696_s11  ;;  %p703_p9 = scmp.lt.u32.totalorder %s701_s14, %s696_s11 }
  0x3b   : > { %p705_p2 = scmp.lt.u32.totalorder %s696_s11, %s974_s25 }
  0x3c   : > { %p699_p3 = pnand %p698_p0, %p697_p13  ;;  %p704_p1 = por %p703_p9, %p702_p7 }
  0x3e   : > { %p700_p5 = pneg %p699_p3  ;;  %p706_p4 = por %p705_p2, %p704_p1 }
  0x40   : > { %p707_p6 = pnand %p706_p4, %p700_p5 }
  0x42   : > { %710 = shalt.err (!%p707_p6)
}
  0x43   : > { %s711_s5 = scalar_lea.vmem %s981_s29, 256  ;;  %s835_s8 = smov [#allocation2]  }
  0x44   : > { %p712_p8 = scmp.ne.s32.totalorder %s981_s29, %s711_s5  ;;  %s716_s28 = sshll.u32 %s835_s8, 4  ;;  %s717_s28 = int_to_ptr.vmem [resolvable:$false] %s716_s28 }
  0x45   : > { %s718_s12 = scalar_lea.vmem %s717_s28, 512  ;;  %p719_p3 = scmp.lt.s32.totalorder %s981_s29, %s717_s28 }
  0x46   : > { %p714_p10 = pnand %p712_p8, %p698_p0  ;;  %p720_p7 = scmp.lt.s32.totalorder %s718_s12, %s711_s5 }
  0x48   : > { %p715_p13 = pneg %p714_p10  ;;  %p721_p9 = por %p720_p7, %p719_p3 }
  0x4a   : > { %p722_p1 = pnand %p721_p9, %p715_p13 }
  0x4c   : > { %725 = shalt.err (!%p722_p1)
}
  0x4d   : > { %s836_s11 = smov 128   ;;  %s837_s13 = smov 8  }
  0x4e   : > { %610 = dma.hbm_to_vmem [thread:$0]  (!%p977_p11), %s974_s25, 256, %s981_s29, %s983_s10, %s836_s11, %s836_s11, %s837_s13  }
  0x4f   : > { %s1019_s26 = scalar_lea.hbm %s1133_s1, %s565_s6  ;;  %s202_s5 = scalar_lea.vmem [#allocation5], %s967_s7 }
  0x50   : > { %s209_s8 = sshll.u32 %s202_s5, 4  ;;  %s198_s28 = sand.u32 1, %s830_s18   ;;  %s1023_s8 = int_to_ptr.vmem [resolvable:$true] %s209_s8 }
  0x51   : > { %s1025_s12 = scalar_lea.sflag [#allocation6], %s198_s28  ;;  %s726_s0 = scalar_lea.hbm %s1019_s26, 256 }
  0x52   : > { %p727_p5 = scmp.ne.s32.totalorder %s1019_s26, %s726_s0  ;;  %s731_s29 = scalar_lea.hbm %s1133_s1, 512 }
  0x53   : > { %p732_p6 = scmp.lt.u32.totalorder %s1019_s26, %s1133_s1  ;;  %p733_p8 = scmp.lt.u32.totalorder %s731_s29, %s726_s0 }
  0x54   : > { %p729_p2 = pnand %p727_p5, %p698_p0  ;;  %p735_p13 = scmp.lt.u32.totalorder %s726_s0, %s1019_s26 }
  0x55   : > { %p734_p10 = por %p733_p8, %p732_p6 }
  0x56   : > { %p730_p4 = pneg %p729_p2 }
  0x57   : > { %p736_p3 = por %p735_p13, %p734_p10 }
  0x59   : > { %p737_p7 = pnand %p736_p3, %p730_p4 }
  0x5b   : > { %740 = shalt.err (!%p737_p7)
}
  0x5c   : > { %s741_s7 = scalar_lea.vmem %s1023_s8, 256  ;;  %s838_s20 = smov [#allocation5]  }
  0x5d   : > { %p742_p9 = scmp.ne.s32.totalorder %s1023_s8, %s741_s7  ;;  %s746_s5 = sshll.u32 %s838_s20, 4  ;;  %s747_s5 = int_to_ptr.vmem [resolvable:$false] %s746_s5 }
  0x5e   : > { %s748_s28 = scalar_lea.vmem %s747_s5, 512  ;;  %p749_p2 = scmp.lt.s32.totalorder %s1023_s8, %s747_s5 }
  0x5f   : > { %p744_p1 = pnand %p742_p9, %p698_p0  ;;  %p750_p6 = scmp.lt.s32.totalorder %s748_s28, %s741_s7 }
  0x61   : > { %p745_p5 = pneg %p744_p1  ;;  %p751_p8 = por %p750_p6, %p749_p2 }
  0x63   : > { %p752_p10 = pnand %p751_p8, %p745_p5 }
  0x65   : > { %755 = shalt.err (!%p752_p10)
}
  0x66   : > { %613 = dma.hbm_to_vmem [thread:$0]  (!%p977_p11), %s1019_s26, 256, %s1023_s8, %s1025_s12, %s836_s11, %s836_s11, %s837_s13  }
  0x67   : > { %p1149_p0 = scmp.ne.s32.totalorder %s1143_s23, 0 }
  0x68   : > { %s1057_s0 = sand.u32 (!%p1149_p0), 1, %s822_s16   ;;  %p1150_p4 = scmp.ne.s32.totalorder (!%p1149_p0), %s1141_s21, 0 }
  0x69   : > { %221 = sbr.rel (%p1149_p0) target bundleno = 690 (0x2b2), region = 36  ;;  %s1060_s25 = sshll.u32 (!%p1149_p0), %s1057_s0, 4 }
  0x6a   : > { %s224_s9 = scalar_lea.sflag (!%p1149_p0), [#allocation3], %s1057_s0  ;;  %s227_s6 = scalar_lea.vmem (!%p1149_p0), [#allocation2], %s1060_s25 }
  0x70   : > { %801 = dma.done.wait (%p1150_p4), %s224_s9, 256  }
  0x71   : > { %803 = vsyncadd (%p1150_p4), %s224_s9, 4294967040  ;;  %s232_s23 = sand.u32 1, %s891_s19   ;;  %s236_s13 = scalar_lea.vmem [#allocation5], %s1060_s25 }
  0x72   : > { %s233_s11 = scalar_lea.sflag [#allocation6], %s232_s23 }
  0x73   : > { %805 = dma.done.wait (%p1150_p4), %s233_s11, 256  }
  0x74   : > { %807 = vsyncadd (%p1150_p4), %s233_s11, 4294967040  ;;  %p1151_p11 = scmp.eq.s32.totalorder %s891_s19, 0 }
  0x76   : > { %809 = dma.done.wait (%p1151_p11), [#allocation6], 512   ;;  %p1152_p13 = pmov %p1151_p11 }
  0x77   : > { %v839_v0 = vmov 0.0   ;;  %vm840_vm0 = vmmov 0   ;;  %v274_v1 = vld [vmem:[%s236_s13] sm:$0xff]  ;;  %v275_v2 = vld [vmem:[%s236_s13 + $0x8] sm:$0xff]  ;;  %vm277_vm1 = vcmask 130048   ;;  %s841_s21 = smov 32  }
  0x78   : > { %811 = vsyncadd (%p1152_p13), [#allocation6], 4294966784  ;;  %575 = vmatprep.subr.bf16.mxu0 %v839_v0  ;;  %577 = vmatprep.mubr.msk.bf16.mxu0 %vm840_vm0, %v839_v0  ;;  %v271_v3 = vld [vmem:[%s227_s6] sm:$0xff]  ;;  %v276_v4 = vpack.c.bf16 %v275_v2, %v274_v1  ;;  %v272_v5 = vld [vmem:[%s227_s6 + $0x8] sm:$0xff]  ;;  %vm326_vm2 = vcmask 261120   ;;  %vm362_vm3 = vcmask 523264  }
  0x79   : > { %581 = vmatprep.subr.bf16.mxu1 %v839_v0  ;;  %589 = vmatprep.mubr.msk.bf16.mxu1 %vm840_vm0, %v839_v0  ;;  %v273_v6 = vpack.c.bf16 %v272_v5, %v271_v3  ;;  %v664_v7 = vld [vmem:[#allocation7] sm:$0xff]   ;;  %v665_v8 = vld [vmem:[#allocation7 + $0x8] sm:$0xff]   ;;  %v666_v9 = vld [vmem:[#allocation7 + $0x10] sm:$0xff]   ;;  %s269_s12 = scalar_lea.vmem [#allocation8], %s1060_s25  ;;  %s567_s10 = sshll.u32 %s891_s19, 8 }
  0x7a   : > { %576 = vmatpush3.bf16.msra.mxu0 %v276_v4  ;;  %582 = vmatpush3.bf16.msra.mxu1 %v664_v7  ;;  %v667_v10 = vld [vmem:[#allocation7 + $0x18] sm:$0xff]   ;;  %v559_v18 = vld [vmem:[%s1135_s3] ss:$0 sm:$0xff]  ;;  %s433_s29 = sshll.u32 %s269_s12, 4  ;;  %s1088_s20 = scalar_lea.hbm %s1136_s4, %s567_s10  ;;  %s1083_s29 = int_to_ptr.vmem [resolvable:$true] %s433_s29 }
  0x7b   : > { %583 = vmatprep.subr.bf16.mxu1 %v839_v0  ;;  %s420_s5 = scalar_lea.sflag [#allocation4], %s1057_s0  ;;  %s756_s28 = scalar_lea.vmem %s1083_s29, 256 }
  0x7c   : > { %p757_p3 = scmp.ne.s32.totalorder %s1083_s29, %s756_s28  ;;  %s842_s19 = smov [#allocation8]  }
  0x7d   : > { %578 = vmatmul.mubr.msk.bf16.vlgmr.msra.gmra.mrb[0].mxu0 %vm277_vm1, %v273_v6  ;;  %s760_s25 = sshll.u32 %s842_s19, 4  ;;  %s761_s25 = int_to_ptr.vmem [resolvable:$false] %s760_s25 }
  0x7e   : > { %584 = vmatpush3.bf16.msra.mxu1 %v665_v8  ;;  %p758_p7 = pnand %p757_p3, %p961_p12  ;;  %s762_s9 = scalar_lea.vmem %s761_s25, 512 }
  0x7f   : > { %585 = vmatprep.subr.bf16.mxu1 %v839_v0  ;;  %p763_p1 = scmp.lt.s32.totalorder %s1083_s29, %s761_s25  ;;  %p764_p5 = scmp.lt.s32.totalorder %s762_s9, %s756_s28 }
  0x80   : > { %p759_p9 = pneg %p758_p7 }
  0x81   : > { %p765_p2 = por %p764_p5, %p763_p1 }
  0x82   : > { %586 = vmatpush3.bf16.msra.mxu1 %v666_v9 }
  0x83   : > { %587 = vmatprep.subr.bf16.mxu1 %v839_v0  ;;  %p766_p6 = pnand %p765_p2, %p759_p9 }
  0x86   : > { %588 = vmatpush3.bf16.msra.mxu1 %v667_v10 }
 0x150   : > { %v315_v11 = vpop.f32.mrb[0].mxu0 }
 0x151   : > { %v579_v12 = vpop.f32.mrb[1].mxu0 }
 0x152   : > { %v318_v13 = vpop.f32.mrb[2].mxu0 }
 0x153   : > { %v322_v14 = vpack.c.bf16 %v318_v13, %v315_v11  ;;  %v580_v15 = vpop.f32.mrb[3].mxu0 }
 0x155   : > { %324 = vrot.lane.b32.xlu0 %v322_v14, %s841_s21 }
 0x1c7   : > { %v325_v16 = vpop.permute.xlu0 %324 }
 0x1c8   : > { %v329_v17 = vsel %vm326_vm2, %v276_v4, %v325_v16 }
 0x1c9   : > { %590 = vmatmul.mubr.msk.bf16.vlgmr.msra.gmra.mrb[0].mxu1 %vm362_vm3, %v329_v17 }
 0x29c   : > { %v399_v19 = vpop.f32.mrb[0].mxu1 }
 0x29d   : > { %v413_v20 = vadd.f32 %v559_v18, %v399_v19  ;;  %v591_v21 = vpop.f32.mrb[1].mxu1 }
 0x29e   : > { %v402_v22 = vpop.f32.mrb[2].mxu1 }
 0x29f   : > { %v415_v23 = vmax.f32 %v413_v20, 0.0  ;;  %v414_v24 = vadd.f32 %v559_v18, %v402_v22  ;;  %v592_v25 = vpop.f32.mrb[3].mxu1 }
 0x2a1   : > { %417 = vst [vmem:[%s269_s12] sm:$0xff] %v415_v23  ;;  %v416_v26 = vmax.f32 %v414_v24, 0.0 }
 0x2a3   : > { %418 = vst [vmem:[%s269_s12 + $0x8] sm:$0xff] %v416_v26 }
 0x2a4   : > { %769 = shalt.err (!%p766_p6)
}
 0x2a5   : > { %s770_s6 = scalar_lea.hbm %s1088_s20, 256  ;;  %s774_s13 = scalar_lea.hbm %s1136_s4, 512 }
 0x2a6   : > { %p771_p8 = scmp.ne.s32.totalorder %s1088_s20, %s770_s6  ;;  %p775_p4 = scmp.lt.u32.totalorder %s1088_s20, %s1136_s4 }
 0x2a7   : > { %p776_p11 = scmp.lt.u32.totalorder %s774_s13, %s770_s6  ;;  %p778_p3 = scmp.lt.u32.totalorder %s770_s6, %s1088_s20 }
 0x2a8   : > { %p772_p10 = pnand %p771_p8, %p961_p12 }
 0x2a9   : > { %p777_p13 = por %p776_p11, %p775_p4 }
 0x2aa   : > { %p773_p0 = pneg %p772_p10 }
 0x2ab   : > { %p779_p7 = por %p778_p3, %p777_p13 }
 0x2ad   : > { %p780_p9 = pnand %p779_p7, %p773_p0 }
 0x2af   : > { %783 = shalt.err (!%p780_p9)
}
 0x2b0   : > { %s843_s8 = smov 128   ;;  %s844_s12 = smov 8  }
 0x2b1   : > { %601 = dma.vmem_to_hbm [thread:$0]  (%p961_p12), %s1083_s29, 256, %s1088_s20, %s420_s5, %s843_s8, %s843_s8, %s844_s12  }
 0x2b2 PF: > { %s448_s10 = sand.u32 1, %s818_s15   ;;  %p1153_p1 = scmp.ne.s32.totalorder %s1142_s22, 0 }
 0x2b3   : > { %p1154_p5 = scmp.ge.s32.totalorder %s830_s18, 2  ;;  %s449_s14 = scalar_lea.sflag [#allocation4], %s448_s10 }
 0x2b5   : > { %p615_p2 = pnand %p1154_p5, %p1153_p1 }
 0x2b7   : > { %813 = dma.done.wait (!%p615_p2), %s449_s14, 256  }
 0x2b8   : > { %815 = vsyncadd (!%p615_p2), %s449_s14, 4294967040  ;;  %p20_p6 = scmp.ge.s32.totalorder %s926_s27, 4   ;;  %s1155_s15 = smov %s822_s16 }
 0x2b9   : > { %s1156_s16 = smov %s826_s17  ;;  %s1157_s17 = smov %s957_s24 }
 0x2ba   : > { %s1158_s18 = smov %s926_s27  ;;  %22 = sbr.rel (!%p20_p6) target bundleno = 9 (0x9), region = 98 }
 0x2c1   :  { %454 = vsyncpa [#allocation3], 1 }
 0x2c2   :  { %456 = vsyncpa [#allocation3 + $0x1], 1 }
 0x2c3   :  { %457 = vsyncpa [#allocation6], 1 }
 0x2c4   :  { %459 = vsyncpa [#allocation6 + $0x1], 1 }
 0x2c5   :  { %460 = vsyncpa [#allocation4], 1 }
 0x2c6   :  { %462 = vsyncpa [#allocation4 + $0x1], 1 }

</bundles_post_ra>
